<compile_context>
chip_gen: v5e
topology: v5e:2x2
jax: 0.10.0
libtpu: 0.0.40
codegen_flags: <defaults>
</compile_context>

<pallas_src>
import jax
import jax.numpy as jnp
from jax.experimental import pallas as pl
from jax.experimental.pallas import tpu as pltpu


TM_MAX = 2048  # max batch-tile rows; ~5.5 MiB of bf16 buffers at tm=2048


def fusion_classifier_kernel(ft_ref, fr_ref, w_ref, b_ref, o_ref):
    D = ft_ref.shape[1]                      # per-modality feature dim (256)
    ft = ft_ref[...]
    fr = fr_ref[...]
    # Caller contract is bf16 activations; only cast if handed f32 (robustness).
    if ft.dtype != jnp.bfloat16:
        ft = ft.astype(jnp.bfloat16)
        fr = fr.astype(jnp.bfloat16)
    # Static, tile-aligned row slices of the resident (2D, C_pad) weight slab.
    wt = w_ref[0:D, :]
    wr = w_ref[D:2 * D, :]
    # Equivalent to cat([ft, fr], 1) @ W.T : two K=256 dots accumulated in f32.
    acc = jnp.dot(ft, wt, preferred_element_type=jnp.float32)
    acc = acc + jnp.dot(fr, wr, preferred_element_type=jnp.float32)
    # Lane-dense bias add (bias padded to C_pad) + unmasked full-vreg store.
    o_ref[...] = (acc + b_ref[...]).astype(o_ref.dtype)


def prepare_params(weight, bias, param_dtype=jnp.bfloat16):
    """One-time param packing: (num_classes, 512) -> (512, C_pad) bf16, bias -> (1, C_pad) f32.

    Padded columns are zero so they never leak garbage into real outputs.
    """
    C, K = weight.shape
    c_pad = max(128, ((C + 127) // 128) * 128)
    w_packed = jnp.zeros((K, c_pad), param_dtype)
    w_packed = w_packed.at[:, :C].set(weight.T.astype(param_dtype))
    b_packed = jnp.zeros((1, c_pad), jnp.float32)
    b_packed = b_packed.at[:, :C].set(bias.astype(jnp.float32))
    return w_packed, b_packed


def _choose_tm(B):
    if B <= 64:
        return B  # single tile; block equals full batch dim so no (8,128) issue
    tm = -(-B // 2)                 # cdiv(B, 2): guarantee >= 2 tiles for v7x
    tm = ((tm + 7) // 8) * 8        # sublane-align
    return min(tm, TM_MAX)


def fusion_classifier(feat_thermal, feat_rgb, w_packed, b_packed,
                      num_classes=None, out_dtype=None):
    """Fused cat + linear head.

    feat_thermal, feat_rgb: (B, 256), preferably bf16 (caller contract).
    w_packed: (512, C_pad) bf16; b_packed: (1, C_pad) f32.
    Returns (B, C_pad) logits (padded cols are zero) unless num_classes is given,
    in which case the real columns are sliced out (extra HBM pass — avoid if the
    downstream can consume the padded layout).
    """
    B, D = feat_thermal.shape
    K, c_pad = w_packed.shape
    assert K == 2 * D
    assert feat_rgb.shape == (B, D)

    if out_dtype is None:
        out_dtype = feat_thermal.dtype

    tm = _choose_tm(B)
    grid = (pl.cdiv(B, tm),)

    in_bytes = 2 * B * D * feat_thermal.dtype.itemsize
    w_bytes = K * c_pad * w_packed.dtype.itemsize + c_pad * 4
    out_bytes = B * c_pad * jnp.dtype(out_dtype).itemsize

    out_padded = pl.pallas_call(
        fusion_classifier_kernel,
        out_shape=jax.ShapeDtypeStruct((B, c_pad), out_dtype),
        grid=grid,
        in_specs=[
            pl.BlockSpec((tm, D), lambda i: (i, 0)),         # feat_thermal tile
            pl.BlockSpec((tm, D), lambda i: (i, 0)),         # feat_rgb tile
            pl.BlockSpec((2 * D, c_pad), lambda i: (0, 0)),  # weight: resident across tiles
            pl.BlockSpec((1, c_pad), lambda i: (0, 0)),      # bias: resident across tiles
        ],
        out_specs=pl.BlockSpec((tm, c_pad), lambda i: (i, 0)),
        compiler_params=pltpu.CompilerParams(
            dimension_semantics=("parallel",),
        ),
        cost_estimate=pl.CostEstimate(
            flops=2 * B * K * c_pad,
            transcendentals=0,
            bytes_accessed=in_bytes + w_bytes + out_bytes,
        ),
    )(feat_thermal, feat_rgb, w_packed, b_packed)

    if num_classes is not None and num_classes != c_pad:
        return out_padded[:, :num_classes]
    return out_padded


def init_params(key, num_classes, in_features=512, dtype=jnp.float32):
    # Deterministic init mimicking nn.Linear default (uniform +/- 1/sqrt(fan_in)).
    kw, kb = jax.random.split(key)
    bound = 1.0 / (in_features ** 0.5)
    weight = jax.random.uniform(kw, (num_classes, in_features), dtype, -bound, bound)
    bias = jax.random.uniform(kb, (num_classes,), dtype, -bound, bound)
    return weight, bias


if __name__ == "__main__":
    key = jax.random.PRNGKey(0)
    k1, k2, k3 = jax.random.split(key, 3)

    B = 2
    D = 256          # per-modality feature dim (fc expects 256 * 2 inputs)
    num_classes = 10

    # Backbone contract: features arrive in bf16 (no separate wrapper cast pass).
    feat_thermal = jax.random.normal(k1, (B, D), jnp.float32).astype(jnp.bfloat16)
    feat_rgb = jax.random.normal(k2, (B, D), jnp.float32).astype(jnp.bfloat16)
    weight, bias = init_params(k3, num_classes)

    # One-time parameter packing (pre-transpose + lane pad + bf16).
    w_packed, b_packed = prepare_params(weight, bias)

    # Default path: padded (B, C_pad) bf16 logits, no post-kernel slice kernel.
    out_padded = fusion_classifier(feat_thermal, feat_rgb, w_packed, b_packed)
    out_padded = jax.block_until_ready(out_padded)

    # Reference check against plain JAX (cat + linear) in f32. Tolerance reflects
    # bf16 inputs/weights/output with f32 accumulation (~1e-3 relative); any
    # downstream loss/softmax should upcast these bf16 logits to f32.
    ft32 = feat_thermal.astype(jnp.float32)
    fr32 = feat_rgb.astype(jnp.float32)
    ref = jnp.concatenate([ft32, fr32], axis=1) @ weight.T + bias

    c_pad = w_packed.shape[1]
    assert out_padded.shape == (B, c_pad)
    out = out_padded[:, :num_classes].astype(jnp.float32)
    assert jnp.allclose(out, ref, atol=3e-2, rtol=3e-2), (
        f"max abs err {jnp.max(jnp.abs(out - ref))}")
    # Padded columns stay exactly zero (zero weight cols + zero bias pad).
    assert jnp.all(out_padded[:, num_classes:] == 0)

    print("KERNEL_OK")
</pallas_src>

<mosaic_0001>
module attributes {stable_mosaic.version = 11 : i64} {
  func.func @fusion_classifier_kernel(%arg0: i32, %arg1: memref<2x256xbf16, #tpu.memory_space<vmem>>, %arg2: memref<2x256xbf16, #tpu.memory_space<vmem>>, %arg3: memref<512x128xbf16, #tpu.memory_space<vmem>>, %arg4: memref<1x128xf32, #tpu.memory_space<vmem>>, %arg5: memref<2x128xbf16, #tpu.memory_space<vmem>>) attributes {dimension_semantics = [#tpu.dimension_semantics<parallel>], iteration_bounds = array<i64: 1>, scalar_prefetch = 0 : i64, scratch_operands = 0 : i64, tpu.core_type = #tpu.core_type<tc>, window_params = [{transform_indices = @transform_0, window_bounds = array<i64: 2, 256>}, {transform_indices = @transform_1, window_bounds = array<i64: 2, 256>}, {pipeline_mode = #tpu.pipeline_mode<synchronous>, transform_indices = @transform_2, window_bounds = array<i64: 512, 128>}, {pipeline_mode = #tpu.pipeline_mode<synchronous>, transform_indices = @transform_3, window_bounds = array<i64: 1, 128>}, {transform_indices = @transform_4, window_bounds = array<i64: 2, 128>}]} {
    %c0 = arith.constant 0 : index
    %c0_0 = arith.constant 0 : index
    %0 = vector.load %arg1[%c0, %c0_0] : memref<2x256xbf16, #tpu.memory_space<vmem>>, vector<2x256xbf16>
    %c0_1 = arith.constant 0 : index
    %c0_2 = arith.constant 0 : index
    %1 = vector.load %arg2[%c0_1, %c0_2] : memref<2x256xbf16, #tpu.memory_space<vmem>>, vector<2x256xbf16>
    %c0_3 = arith.constant 0 : index
    %c0_4 = arith.constant 0 : index
    %2 = vector.load %arg3[%c0_3, %c0_4] : memref<512x128xbf16, #tpu.memory_space<vmem>>, vector<256x128xbf16>
    %c256 = arith.constant 256 : index
    %c0_5 = arith.constant 0 : index
    %3 = vector.load %arg3[%c256, %c0_5] : memref<512x128xbf16, #tpu.memory_space<vmem>>, vector<256x128xbf16>
    %cst = arith.constant dense<0.000000e+00> : vector<2x128xf32>
    %4 = tpu.matmul %0, %2, %cst {dimension_numbers = #tpu.dot_dimension_numbers<[1], [0], [0], [1], [0, 0, 1, 1], [], []>} : vector<2x256xbf16>, vector<256x128xbf16>, vector<2x128xf32> -> vector<2x128xf32>
    %cst_6 = arith.constant dense<0.000000e+00> : vector<2x128xf32>
    %5 = tpu.matmul %1, %3, %cst_6 {dimension_numbers = #tpu.dot_dimension_numbers<[1], [0], [0], [1], [0, 0, 1, 1], [], []>} : vector<2x256xbf16>, vector<256x128xbf16>, vector<2x128xf32> -> vector<2x128xf32>
    %6 = arith.addf %4, %5 : vector<2x128xf32>
    %c0_7 = arith.constant 0 : index
    %c0_8 = arith.constant 0 : index
    %7 = vector.load %arg4[%c0_7, %c0_8] : memref<1x128xf32, #tpu.memory_space<vmem>>, vector<1x128xf32>
    %8 = vector.broadcast %7 : vector<1x128xf32> to vector<2x128xf32>
    %9 = arith.addf %6, %8 : vector<2x128xf32>
    %10 = arith.truncf %9 : vector<2x128xf32> to vector<2x128xbf16>
    %c0_9 = arith.constant 0 : index
    %c0_10 = arith.constant 0 : index
    %11 = vector.load %arg5[%c0_9, %c0_10] : memref<2x128xbf16, #tpu.memory_space<vmem>>, vector<2x128xbf16>
    tpu.vector_store %arg5[%c0_9, %c0_10], %10 {strides = array<i32>} : memref<2x128xbf16, #tpu.memory_space<vmem>>, vector<2x128xbf16>,
    return
  }
  func.func @transform_0(%arg0: i32) -> (i32, i32) {
    %c0_i32 = arith.constant 0 : i32
    %c0_i32_0 = arith.constant 0 : i32
    return %arg0, %c0_i32 : i32, i32
  }
  func.func @transform_1(%arg0: i32) -> (i32, i32) {
    %c0_i32 = arith.constant 0 : i32
    %c0_i32_0 = arith.constant 0 : i32
    return %arg0, %c0_i32 : i32, i32
  }
  func.func @transform_2(%arg0: i32) -> (i32, i32) {
    %c0_i32 = arith.constant 0 : i32
    %c0_i32_0 = arith.constant 0 : i32
    %c0_i32_1 = arith.constant 0 : i32
    return %c0_i32, %c0_i32_0 : i32, i32
  }
  func.func @transform_3(%arg0: i32) -> (i32, i32) {
    %c0_i32 = arith.constant 0 : i32
    %c0_i32_0 = arith.constant 0 : i32
    %c0_i32_1 = arith.constant 0 : i32
    return %c0_i32, %c0_i32_0 : i32, i32
  }
  func.func @transform_4(%arg0: i32) -> (i32, i32) {
    %c0_i32 = arith.constant 0 : i32
    %c0_i32_0 = arith.constant 0 : i32
    return %arg0, %c0_i32 : i32, i32
  }
}

</mosaic_0001>

<bundles_post_ra>
// kernel: tpu_custom_call.1
= control target key start
LH: loop header
LB: loop body
LE: loop exit
PB: predicated region body
PF: predicated region fallthrough
CT: control target
= control target key end

     0   :  { %9 = vsyncpa [#allocation3], 0  ;;  %s723_s0 = inlined_call_operand.hbm [shape: bf16[2,256], index: 0, kind: input, shape index: {}]   ;;  %s724_s1 = inlined_call_operand.hbm [shape: bf16[2,256], index: 1, kind: input, shape index: {}]   ;;  %s725_s2 = inlined_call_operand.hbm [shape: bf16[512,128], index: 2, kind: input, shape index: {}]   ;;  %s726_s3 = inlined_call_operand.vmem [shape: f32[1,128], index: 3, kind: input, shape index: {}]   ;;  %s727_s4 = inlined_call_operand.hbm [shape: bf16[2,128], index: 4, kind: output, shape index: {}]  }
   0x1   :  { %10 = vsyncpa [#allocation6], 0  ;;  %s28_s17 = sshll.u32 %s724_s1, 4  ;;  %s29_s17 = int_to_ptr.hbm [resolvable:$true] %s28_s17 }
   0x2   :  { %11 = vsyncpa [#allocation4], 0  ;;  %s677_s18 = smov [#allocation5]   ;;  %s17_s22 = sshll.u32 %s723_s0, 4  ;;  %s18_s22 = int_to_ptr.hbm [resolvable:$true] %s17_s22 }
   0x3   :  { %s30_s19 = sshll.u32 %s677_s18, 4  ;;  %s678_s23 = smov [#allocation2]   ;;  %s31_s19 = int_to_ptr.vmem [resolvable:$true] %s30_s19 }
   0x4   :  { %33 = dma.hbm_to_vmem [thread:$0]  %s29_s17, 32, %s31_s19, [#allocation6]  }
   0x5   :  { %s19_s24 = sshll.u32 %s678_s23, 4  ;;  %s38_s27 = sshll.u32 %s725_s2, 4  ;;  %s20_s24 = int_to_ptr.vmem [resolvable:$true] %s19_s24  ;;  %s39_s27 = int_to_ptr.hbm [resolvable:$true] %s38_s27 }
   0x6   :  { %22 = dma.hbm_to_vmem [thread:$0]  %s18_s22, 32, %s20_s24, [#allocation3]  }
   0x7   :  { %s679_s1 = smov [#allocation7]   ;;  %s680_s29 = smov 64  }
   0x8   :  { %s40_s28 = sshll.u32 %s679_s1, 4  ;;  %s681_s30 = smov 4   ;;  %s41_s28 = int_to_ptr.vmem [resolvable:$true] %s40_s28 }
   0x9   :  { %46 = dma.hbm_to_vmem [thread:$0]  %s39_s27, 4096, %s41_s28, [#allocation6], %s680_s29, %s680_s29, %s681_s30  }
   0xa   :  { %671 = dma.done.wait [#allocation3], 32  }
   0xb   :  { %672 = vsyncadd [#allocation3], 4294967264 }
   0xc   :  { %673 = dma.done.wait [#allocation6], 4128  }
   0xd   :  { %674 = vsyncadd [#allocation6], 4294963168  ;;  %v559_v0 = vld [vmem:[#allocation7 + $0xb8] sm:$0xff]  ;;  %v558_v4 = vld [vmem:[#allocation7 + $0xb0] sm:$0xff]  ;;  %s682_s5 = smov [#allocation8]   ;;  %s397_s9 = sshll.u32 %s727_s4, 4  ;;  %s398_s9 = int_to_ptr.hbm [resolvable:$true] %s397_s9 }
   0xe   :  { %v567_v1 = vld [vmem:[#allocation7 + $0xf8] sm:$0xff]  ;;  %229 = vmatpush.bf16.msra.mxu0 %v559_v0  ;;  %v566_v5 = vld [vmem:[#allocation7 + $0xf0] sm:$0xff]  ;;  %v557_v8 = vld [vmem:[#allocation7 + $0xa8] sm:$0xff]  ;;  %s395_s6 = sshll.u32 %s682_s5, 4  ;;  %s396_s6 = int_to_ptr.vmem [resolvable:$true] %s395_s6 }
   0xf   :  { %v543_v2 = vld [vmem:[#allocation7 + $0x38] sm:$0xff]  ;;  %242 = vmatpush.bf16.msra.mxu1 %v567_v1  ;;  %v542_v6 = vld [vmem:[#allocation7 + $0x30] sm:$0xff]  ;;  %v565_v9 = vld [vmem:[#allocation7 + $0xe8] sm:$0xff] }
  0x10   :  { %v551_v3 = vld [vmem:[#allocation7 + $0x78] sm:$0xff]  ;;  %357 = vmatpush.bf16.msra.mxu2 %v543_v2  ;;  %v550_v7 = vld [vmem:[#allocation7 + $0x70] sm:$0xff]  ;;  %v541_v10 = vld [vmem:[#allocation7 + $0x28] sm:$0xff] }
  0x11   :  { %370 = vmatpush.bf16.msra.mxu3 %v551_v3  ;;  %v549_v11 = vld [vmem:[#allocation7 + $0x68] sm:$0xff]  ;;  %v556_v12 = vld [vmem:[#allocation7 + $0xa0] sm:$0xff]  ;;  %v62_v14 = vld [vmem:[#allocation5] sm:$0x3] }
  0x12   :  { %230 = vmatpush.bf16.msra.mxu0 %v558_v4  ;;  %v564_v13 = vld [vmem:[#allocation7 + $0xe0] sm:$0xff]  ;;  %128 = vst [vmem:[#allocation1] ss:$9 sm:$0xff] %v62_v14  ;;  %v555_v17 = vld [vmem:[#allocation7 + $0x98] sm:$0xff]  ;;  %v554_v22 = vld [vmem:[#allocation7 + $0x90] sm:$0xff] }
  0x13   :  { %243 = vmatpush.bf16.msra.mxu1 %v566_v5  ;;  %v540_v15 = vld [vmem:[#allocation7 + $0x20] sm:$0xff]  ;;  %v563_v18 = vld [vmem:[#allocation7 + $0xd8] sm:$0xff]  ;;  %v562_v23 = vld [vmem:[#allocation7 + $0xd0] sm:$0xff] }
  0x14   :  { %358 = vmatpush.bf16.msra.mxu2 %v542_v6  ;;  %v548_v16 = vld [vmem:[#allocation7 + $0x60] sm:$0xff]  ;;  %v539_v19 = vld [vmem:[#allocation7 + $0x18] sm:$0xff]  ;;  %v538_v26 = vld [vmem:[#allocation7 + $0x10] sm:$0xff] }
  0x15   :  { %371 = vmatpush.bf16.msra.mxu3 %v550_v7  ;;  %v547_v20 = vld [vmem:[#allocation7 + $0x58] sm:$0xff]  ;;  %v546_v27 = vld [vmem:[#allocation7 + $0x50] sm:$0xff]  ;;  %v553_v28 = vld [vmem:[#allocation7 + $0x88] sm:$0xff] }
  0x16   :  { %231 = vmatpush.bf16.msra.mxu0 %v557_v8  ;;  %v61_v21 = vld [vmem:[#allocation2] sm:$0x3]  ;;  %v561_v29 = vld [vmem:[#allocation7 + $0xc8] sm:$0xff]  ;;  %v552_v32 = vld [vmem:[#allocation7 + $0x80] sm:$0xff] }
  0x17   :  { %244 = vmatpush.bf16.msra.mxu1 %v565_v9  ;;  %v537_v30 = vld [vmem:[#allocation7 + $0x8] sm:$0xff]  ;;  %v560_v33 = vld [vmem:[#allocation7 + $0xc0] sm:$0xff]  ;;  %v574_v44 = vld [vmem:[%s726_s3] ss:$0 sm:$0xff] }
  0x18   :  { %359 = vmatpush.bf16.msra.mxu2 %v541_v10  ;;  %v545_v31 = vld [vmem:[#allocation7 + $0x48] sm:$0xff]  ;;  %v536_v34 = vld [vmem:[#allocation7] sm:$0xff] }
  0x19   :  { %372 = vmatpush.bf16.msra.mxu3 %v549_v11  ;;  %v129_v24 = vld [vmem:[#allocation1] sm:$0xff]  ;;  %v130_v25 = vld [vmem:[#allocation1 + $0x9] sm:$0xff] }
  0x1a   :  { %232 = vmatpush.bf16.msra.mxu0 %v556_v12  ;;  %256 = vst [vmem:[#allocation1] ss:$9 sm:$0xff] %v61_v21  ;;  %v544_v35 = vld [vmem:[#allocation7 + $0x40] sm:$0xff] }
  0x1b   :  { %245 = vmatpush.bf16.msra.mxu1 %v564_v13 }
  0x1c   :  { %360 = vmatpush.bf16.msra.mxu2 %v540_v15 }
  0x1d   :  { %373 = vmatpush.bf16.msra.mxu3 %v548_v16 }
  0x1e   :  { %233 = vmatpush.bf16.msra.mxu0 %v555_v17 }
  0x1f   :  { %246 = vmatpush.bf16.msra.mxu1 %v563_v18 }
  0x20   :  { %361 = vmatpush.bf16.msra.mxu2 %v539_v19 }
  0x21   :  { %374 = vmatpush.bf16.msra.mxu3 %v547_v20  ;;  %v257_v36 = vld [vmem:[#allocation1] sm:$0xff]  ;;  %v258_v37 = vld [vmem:[#allocation1 + $0x9] sm:$0xff] }
  0x22   :  { %234 = vmatpush.bf16.msra.mxu0 %v554_v22 }
  0x23   :  { %247 = vmatpush.bf16.msra.mxu1 %v562_v23 }
  0x24   :  { %362 = vmatpush.bf16.msra.mxu2 %v538_v26 }
  0x25   :  { %375 = vmatpush.bf16.msra.mxu3 %v546_v27 }
  0x26   :  { %235 = vmatpush.bf16.msra.mxu0 %v553_v28 }
  0x27   :  { %248 = vmatpush.bf16.msra.mxu1 %v561_v29 }
  0x28   :  { %363 = vmatpush.bf16.msra.mxu2 %v537_v30 }
  0x29   :  { %376 = vmatpush.bf16.msra.mxu3 %v545_v31 }
  0x2a   :  { %236 = vmatpush.bf16.msra.mxu0 %v552_v32 }
  0x2b   :  { %249 = vmatpush.bf16.msra.mxu1 %v560_v33 }
  0x2c   :  { %364 = vmatpush.bf16.msra.mxu2 %v536_v34 }
  0x2d   :  { %377 = vmatpush.bf16.msra.mxu3 %v544_v35  ;;  %237 = vmatmul.bf16.vlgmr.msra.gmra.mxu0 %v129_v24 }
  0x2e   :  { %250 = vmatmul.bf16.vlgmr.msra.gmra.mxu1 %v130_v25 }
  0x2f   :  { %365 = vmatmul.bf16.vlgmr.msra.gmra.mxu2 %v257_v36 }
  0x30   :  { %378 = vmatmul.bf16.vlgmr.msra.gmra.mxu3 %v258_v37 }
  0xaa   :  { %v238_v38 = vpop.f32.mrf.mxu0 }
  0xab   :  { %v251_v39 = vpop.f32.mrf.mxu1 }
  0xac   :  { %v252_v40 = vadd.f32 %v251_v39, %v238_v38 }
  0xb2   :  { %v366_v41 = vpop.f32.mrf.mxu2  ;;  %v240_v45 = vpop.f32.mrf.mxu0 }
  0xb3   :  { %v379_v42 = vpop.f32.mrf.mxu3  ;;  %v367_v43 = vadd.f32 %v366_v41, %v252_v40  ;;  %v253_v46 = vpop.f32.mrf.mxu1 }
  0xb5   :  { %v380_v47 = vadd.f32 %v379_v42, %v367_v43 }
  0xb7   :  { %v387_v48 = vadd.f32 %v574_v44, %v380_v47 }
  0xb9   :  { %v388_v49 = vpack.c.bf16 %v387_v48, %v387_v48 }
  0xba   :  { %v368_v50 = vpop.f32.mrf.mxu2 }
  0xbb   :  { %v381_v51 = vpop.f32.mrf.mxu3  ;;  %389 = vst [vmem:[#allocation8] sm:$0x1] %v388_v49 }
  0xbc   :  { %400 = dma.vmem_to_hbm [thread:$0]  %s396_s6, 16, %s398_s9, [#allocation4]  }
  0xbd   :  { %675 = dma.done.wait [#allocation4], 16  }
  0xbe   :  { %676 = vsyncadd [#allocation4], 4294967280 }
  0xbf   :  { %405 = vsyncpa [#allocation3], 1 }
  0xc0   :  { %406 = vsyncpa [#allocation6], 1 }
  0xc1   :  { %407 = vsyncpa [#allocation4], 1 }

</bundles_post_ra>
